<compile_context>
chip_gen: v5e
topology: v5e:2x2
jax: 0.10.0
libtpu: 0.0.40
codegen_flags: <defaults>
</compile_context>

<pallas_src>
import jax
import jax.numpy as jnp
from jax.experimental import pallas as pl
from jax.experimental.pallas import tpu as pltpu

NUM_IN = 4
NUM_H1 = 10
NUM_H2 = 16
NUM_OUT = 8

TILE_B_DEFAULT = 65536            # batch columns per grid step (lane axis)
VMEM_LIMIT_BYTES = 48 * 1024 * 1024  # < v7x 64 MiB physical; >> actual need at default tile


def _mlp_kernel(x_ref, w1_ref, b1_ref, w2_ref, b2_ref, w3_ref, b3_ref, o_ref):
    # x_ref: (NUM_IN, TILE_B) bf16 -- batch on the lane axis.
    x = x_ref[...]

    h1 = jnp.dot(w1_ref[...], x, preferred_element_type=jnp.float32) + b1_ref[...]
    h1 = jnp.maximum(h1, 0.0).astype(jnp.bfloat16)

    h2 = jnp.dot(w2_ref[...], h1, preferred_element_type=jnp.float32) + b2_ref[...]
    h2 = jnp.maximum(h2, 0.0).astype(jnp.bfloat16)

    y = jnp.dot(w3_ref[...], h2, preferred_element_type=jnp.float32) + b3_ref[...]
    o_ref[...] = y.astype(o_ref.dtype)


def _round_up(n, m):
    return ((n + m - 1) // m) * m


def _pick_tile(b, requested):
    """128-multiple tile, no larger than the (lane-rounded) batch, and small
    enough to leave >=2 (prefer >=4) grid steps for megacore sharding."""
    b_lanes = _round_up(max(int(b), 1), 128)
    tile = max(128, _round_up(min(int(requested), b_lanes), 128))
    if b_lanes >= 4 * 128:
        min_steps = 4
    elif b_lanes >= 2 * 128:
        min_steps = 2
    else:
        min_steps = 1
    cap = max(128, ((b_lanes // min_steps) // 128) * 128)
    return min(tile, cap)


def _mlp_pallas(x_t, params, tile_b):
    """x_t: (NUM_IN, B_pad) bf16 with B_pad a multiple of tile_b -> (NUM_OUT, B_pad) f32."""
    w1, b1, w2, b2, w3, b3 = params
    b_pad = x_t.shape[1]
    grid = (b_pad // tile_b,)

    const = lambda shape: pl.BlockSpec(shape, lambda i: (0, 0))  # VMEM-resident weights

    flops = 2 * (NUM_IN * NUM_H1 + NUM_H1 * NUM_H2 + NUM_H2 * NUM_OUT) * b_pad
    bytes_accessed = (
        NUM_IN * b_pad * 2                 # bf16 input stream
        + NUM_OUT * b_pad * 4              # f32 output stream
        + 2 * (NUM_H1 * NUM_IN + NUM_H2 * NUM_H1 + NUM_OUT * NUM_H2)  # bf16 weights
        + 4 * (NUM_H1 + NUM_H2 + NUM_OUT)  # f32 biases
    )

    return pl.pallas_call(
        _mlp_kernel,
        out_shape=jax.ShapeDtypeStruct((NUM_OUT, b_pad), jnp.float32),
        grid=grid,
        in_specs=[
            pl.BlockSpec((NUM_IN, tile_b), lambda i: (0, i)),   # streamed per tile
            const((NUM_H1, NUM_IN)), const((NUM_H1, 1)),
            const((NUM_H2, NUM_H1)), const((NUM_H2, 1)),
            const((NUM_OUT, NUM_H2)), const((NUM_OUT, 1)),
        ],
        out_specs=pl.BlockSpec((NUM_OUT, tile_b), lambda i: (0, i)),
        compiler_params=pltpu.CompilerParams(
            dimension_semantics=("parallel",),
            vmem_limit_bytes=VMEM_LIMIT_BYTES,
        ),
        cost_estimate=pl.CostEstimate(
            flops=flops, transcendentals=0, bytes_accessed=bytes_accessed),
    )(x_t,
      w1.astype(jnp.bfloat16), b1.astype(jnp.float32),
      w2.astype(jnp.bfloat16), b2.astype(jnp.float32),
      w3.astype(jnp.bfloat16), b3.astype(jnp.float32))


def service_model_forward_fb(x_fb, params, tile_b=TILE_B_DEFAULT):
    """Zero-plumbing entry point: x_fb is (4, B) in (features, batch) layout,
    returns (8, B) float32.  If B is a multiple of the chosen tile and x_fb is
    already bf16, no wrapper-side HBM passes are added (cast/pad/slice are
    all no-ops)."""
    f, b = x_fb.shape
    assert f == NUM_IN, f"expected {NUM_IN} input features, got {f}"

    tile_b = _pick_tile(b, tile_b)
    b_pad = _round_up(b, tile_b)

    x_t = x_fb.astype(jnp.bfloat16)
    if b_pad != b:
        x_t = jnp.pad(x_t, ((0, 0), (0, b_pad - b)))

    y_t = _mlp_pallas(x_t, params, tile_b)
    return y_t if b_pad == b else y_t[:, :b]


def service_model_forward(x, params, tile_b=TILE_B_DEFAULT):
    """PyTorch-compatible: x (B, ...) -> Flatten -> (B, 8) float32."""
    b = x.shape[0]
    x2d = x.reshape(b, -1)
    assert x2d.shape[1] == NUM_IN, f"expected {NUM_IN} input features, got {x2d.shape[1]}"
    # Single fused transpose+bf16-cast in, single transpose out (unavoidable
    # for the (B, F) interface; use service_model_forward_fb to avoid them).
    y_t = service_model_forward_fb(x2d.T, params, tile_b=tile_b)
    return y_t.T


def init_params(key):
    """PyTorch Linear default init: U(-1/sqrt(fan_in), 1/sqrt(fan_in)).
    Weights in PyTorch layout (out_features, in_features); bias (out, 1)."""
    keys = jax.random.split(key, 6)

    def linear(kw, kb, fan_in, fan_out):
        bound = 1.0 / jnp.sqrt(float(fan_in))
        w = jax.random.uniform(kw, (fan_out, fan_in), jnp.float32, -bound, bound)
        b = jax.random.uniform(kb, (fan_out, 1), jnp.float32, -bound, bound)
        return w, b

    w1, b1 = linear(keys[0], keys[1], NUM_IN, NUM_H1)
    w2, b2 = linear(keys[2], keys[3], NUM_H1, NUM_H2)
    w3, b3 = linear(keys[4], keys[5], NUM_H2, NUM_OUT)
    return (w1, b1, w2, b2, w3, b3)


def reference_forward(x, params):
    w1, b1, w2, b2, w3, b3 = params
    x2d = x.reshape(x.shape[0], -1).astype(jnp.float32)
    h1 = jnp.maximum(x2d @ w1.T + b1.T, 0.0)
    h2 = jnp.maximum(h1 @ w2.T + b2.T, 0.0)
    return h2 @ w3.T + b3.T


if __name__ == "__main__":
    key = jax.random.PRNGKey(0)
    kx, kx2, kx3, kp = jax.random.split(key, 4)
    params = init_params(kp)

    # bf16 MXU operands vs f32 reference -> relaxed tolerances (per perf review).
    TOL = dict(atol=1e-1, rtol=1e-1)

    # 1) Small PyTorch-layout batch (Flatten is a no-op for (B, 4)).
    x = jax.random.normal(kx, (8, NUM_IN), jnp.float32)
    y = jax.block_until_ready(service_model_forward(x, params))
    assert y.shape == (8, NUM_OUT)
    assert jnp.allclose(y, reference_forward(x, params), **TOL), "mismatch (small batch)"

    # 2) Non-2D input exercising Flatten: (2, 2, 2) -> (2, 4).
    x3 = jax.random.normal(kx3, (2, 2, 2), jnp.float32)
    y3 = jax.block_until_ready(service_model_forward(x3, params))
    assert y3.shape == (2, NUM_OUT)
    assert jnp.allclose(y3, reference_forward(x3, params), **TOL), "mismatch (flatten path)"

    # 3) Ragged batch exercising the multi-step grid + zero-padded tail
    #    (B=300 -> 3 tiles of 128 columns).
    x2 = jax.random.normal(kx2, (300, NUM_IN), jnp.float32)
    y2 = jax.block_until_ready(service_model_forward(x2, params))
    assert y2.shape == (300, NUM_OUT)
    assert jnp.allclose(y2, reference_forward(x2, params), **TOL), "mismatch (gridded batch)"

    # 4) Zero-plumbing (features, batch) entry point: lane-aligned bf16 batch,
    #    no transpose/pad/slice outside the kernel; 2 parallel grid steps.
    x_fb = jax.random.normal(kx, (NUM_IN, 256), jnp.float32).astype(jnp.bfloat16)
    y_fb = jax.block_until_ready(service_model_forward_fb(x_fb, params))
    y_fb_ref = reference_forward(x_fb.astype(jnp.float32).T, params).T
    assert y_fb.shape == (NUM_OUT, 256)
    assert jnp.allclose(y_fb, y_fb_ref, **TOL), "mismatch (features-batch entry)"

    print("KERNEL_OK")
</pallas_src>

<mosaic_0001>
module attributes {stable_mosaic.version = 11 : i64} {
  func.func @_mlp_kernel(%arg0: i32, %arg1: memref<4x128xbf16, #tpu.memory_space<vmem>>, %arg2: memref<10x4xbf16, #tpu.memory_space<vmem>>, %arg3: memref<10x1xf32, #tpu.memory_space<vmem>>, %arg4: memref<16x10xbf16, #tpu.memory_space<vmem>>, %arg5: memref<16x1xf32, #tpu.memory_space<vmem>>, %arg6: memref<8x16xbf16, #tpu.memory_space<vmem>>, %arg7: memref<8x1xf32, #tpu.memory_space<vmem>>, %arg8: memref<8x128xf32, #tpu.memory_space<vmem>>) attributes {dimension_semantics = [#tpu.dimension_semantics<parallel>], iteration_bounds = array<i64: 1>, scalar_prefetch = 0 : i64, scratch_operands = 0 : i64, tpu.core_type = #tpu.core_type<tc>, window_params = [{transform_indices = @transform_0, window_bounds = array<i64: 4, 128>}, {pipeline_mode = #tpu.pipeline_mode<synchronous>, transform_indices = @transform_1, window_bounds = array<i64: 10, 4>}, {pipeline_mode = #tpu.pipeline_mode<synchronous>, transform_indices = @transform_2, window_bounds = array<i64: 10, 1>}, {pipeline_mode = #tpu.pipeline_mode<synchronous>, transform_indices = @transform_3, window_bounds = array<i64: 16, 10>}, {pipeline_mode = #tpu.pipeline_mode<synchronous>, transform_indices = @transform_4, window_bounds = array<i64: 16, 1>}, {pipeline_mode = #tpu.pipeline_mode<synchronous>, transform_indices = @transform_5, window_bounds = array<i64: 8, 16>}, {pipeline_mode = #tpu.pipeline_mode<synchronous>, transform_indices = @transform_6, window_bounds = array<i64: 8, 1>}, {transform_indices = @transform_7, window_bounds = array<i64: 8, 128>}]} {
    %c0 = arith.constant 0 : index
    %c0_0 = arith.constant 0 : index
    %0 = vector.load %arg1[%c0, %c0_0] : memref<4x128xbf16, #tpu.memory_space<vmem>>, vector<4x128xbf16>
    %c0_1 = arith.constant 0 : index
    %c0_2 = arith.constant 0 : index
    %1 = vector.load %arg2[%c0_1, %c0_2] : memref<10x4xbf16, #tpu.memory_space<vmem>>, vector<10x4xbf16>
    %cst = arith.constant dense<0.000000e+00> : vector<10x128xf32>
    %2 = tpu.matmul %1, %0, %cst {dimension_numbers = #tpu.dot_dimension_numbers<[1], [0], [0], [1], [0, 0, 1, 1], [], []>} : vector<10x4xbf16>, vector<4x128xbf16>, vector<10x128xf32> -> vector<10x128xf32>
    %c0_3 = arith.constant 0 : index
    %c0_4 = arith.constant 0 : index
    %3 = vector.load %arg3[%c0_3, %c0_4] : memref<10x1xf32, #tpu.memory_space<vmem>>, vector<10x1xf32>
    %4 = vector.broadcast %3 : vector<10x1xf32> to vector<10x128xf32>
    %5 = arith.addf %2, %4 : vector<10x128xf32>
    %cst_5 = arith.constant 0.000000e+00 : f32
    %6 = vector.broadcast %cst_5 : f32 to vector<10x128xf32>
    %7 = arith.maximumf %5, %6 : vector<10x128xf32>
    %8 = arith.truncf %7 : vector<10x128xf32> to vector<10x128xbf16>
    %c0_6 = arith.constant 0 : index
    %c0_7 = arith.constant 0 : index
    %9 = vector.load %arg4[%c0_6, %c0_7] : memref<16x10xbf16, #tpu.memory_space<vmem>>, vector<16x10xbf16>
    %cst_8 = arith.constant dense<0.000000e+00> : vector<16x128xf32>
    %10 = tpu.matmul %9, %8, %cst_8 {dimension_numbers = #tpu.dot_dimension_numbers<[1], [0], [0], [1], [0, 0, 1, 1], [], []>} : vector<16x10xbf16>, vector<10x128xbf16>, vector<16x128xf32> -> vector<16x128xf32>
    %c0_9 = arith.constant 0 : index
    %c0_10 = arith.constant 0 : index
    %11 = vector.load %arg5[%c0_9, %c0_10] : memref<16x1xf32, #tpu.memory_space<vmem>>, vector<16x1xf32>
    %12 = vector.broadcast %11 : vector<16x1xf32> to vector<16x128xf32>
    %13 = arith.addf %10, %12 : vector<16x128xf32>
    %cst_11 = arith.constant 0.000000e+00 : f32
    %14 = vector.broadcast %cst_11 : f32 to vector<16x128xf32>
    %15 = arith.maximumf %13, %14 : vector<16x128xf32>
    %16 = arith.truncf %15 : vector<16x128xf32> to vector<16x128xbf16>
    %c0_12 = arith.constant 0 : index
    %c0_13 = arith.constant 0 : index
    %17 = vector.load %arg6[%c0_12, %c0_13] : memref<8x16xbf16, #tpu.memory_space<vmem>>, vector<8x16xbf16>
    %cst_14 = arith.constant dense<0.000000e+00> : vector<8x128xf32>
    %18 = tpu.matmul %17, %16, %cst_14 {dimension_numbers = #tpu.dot_dimension_numbers<[1], [0], [0], [1], [0, 0, 1, 1], [], []>} : vector<8x16xbf16>, vector<16x128xbf16>, vector<8x128xf32> -> vector<8x128xf32>
    %c0_15 = arith.constant 0 : index
    %c0_16 = arith.constant 0 : index
    %19 = vector.load %arg7[%c0_15, %c0_16] : memref<8x1xf32, #tpu.memory_space<vmem>>, vector<8x1xf32>
    %20 = vector.broadcast %19 : vector<8x1xf32> to vector<8x128xf32>
    %21 = arith.addf %18, %20 : vector<8x128xf32>
    %c0_17 = arith.constant 0 : index
    %c0_18 = arith.constant 0 : index
    %22 = vector.load %arg8[%c0_17, %c0_18] : memref<8x128xf32, #tpu.memory_space<vmem>>, vector<8x128xf32>
    tpu.vector_store %arg8[%c0_17, %c0_18], %21 {strides = array<i32>} : memref<8x128xf32, #tpu.memory_space<vmem>>, vector<8x128xf32>,
    return
  }
  func.func @transform_0(%arg0: i32) -> (i32, i32) {
    %c0_i32 = arith.constant 0 : i32
    %c0_i32_0 = arith.constant 0 : i32
    return %c0_i32, %arg0 : i32, i32
  }
  func.func @transform_1(%arg0: i32) -> (i32, i32) {
    %c0_i32 = arith.constant 0 : i32
    %c0_i32_0 = arith.constant 0 : i32
    %c0_i32_1 = arith.constant 0 : i32
    return %c0_i32, %c0_i32_0 : i32, i32
  }
  func.func @transform_2(%arg0: i32) -> (i32, i32) {
    %c0_i32 = arith.constant 0 : i32
    %c0_i32_0 = arith.constant 0 : i32
    %c0_i32_1 = arith.constant 0 : i32
    return %c0_i32, %c0_i32_0 : i32, i32
  }
  func.func @transform_3(%arg0: i32) -> (i32, i32) {
    %c0_i32 = arith.constant 0 : i32
    %c0_i32_0 = arith.constant 0 : i32
    %c0_i32_1 = arith.constant 0 : i32
    return %c0_i32, %c0_i32_0 : i32, i32
  }
  func.func @transform_4(%arg0: i32) -> (i32, i32) {
    %c0_i32 = arith.constant 0 : i32
    %c0_i32_0 = arith.constant 0 : i32
    %c0_i32_1 = arith.constant 0 : i32
    return %c0_i32, %c0_i32_0 : i32, i32
  }
  func.func @transform_5(%arg0: i32) -> (i32, i32) {
    %c0_i32 = arith.constant 0 : i32
    %c0_i32_0 = arith.constant 0 : i32
    %c0_i32_1 = arith.constant 0 : i32
    return %c0_i32, %c0_i32_0 : i32, i32
  }
  func.func @transform_6(%arg0: i32) -> (i32, i32) {
    %c0_i32 = arith.constant 0 : i32
    %c0_i32_0 = arith.constant 0 : i32
    %c0_i32_1 = arith.constant 0 : i32
    return %c0_i32, %c0_i32_0 : i32, i32
  }
  func.func @transform_7(%arg0: i32) -> (i32, i32) {
    %c0_i32 = arith.constant 0 : i32
    %c0_i32_0 = arith.constant 0 : i32
    return %c0_i32, %arg0 : i32, i32
  }
}

</mosaic_0001>

<bundles_post_ra>
// kernel: tpu_custom_call.1
= control target key start
LH: loop header
LB: loop body
LE: loop exit
PB: predicated region body
PF: predicated region fallthrough
CT: control target
= control target key end

     0   :  { %vm52_vm0 = vcmask 1041408   ;;  %vm48_vm1 = vcmask 31744   ;;  %v202_v6 = vmov 0   ;;  %s277_s0 = inlined_call_operand.vmem [shape: bf16[4,128], index: 0, kind: input, shape index: {}]   ;;  %s278_s1 = inlined_call_operand.vmem [shape: bf16[10,4], index: 1, kind: input, shape index: {}]   ;;  %s279_s2 = inlined_call_operand.vmem [shape: f32[10,1], index: 2, kind: input, shape index: {}]   ;;  %s280_s3 = inlined_call_operand.vmem [shape: bf16[16,10], index: 3, kind: input, shape index: {}]   ;;  %s281_s4 = inlined_call_operand.vmem [shape: f32[16,1], index: 4, kind: input, shape index: {}]   ;;  %s282_s5 = inlined_call_operand.vmem [shape: bf16[8,16], index: 5, kind: input, shape index: {}]   ;;  %s283_s6 = inlined_call_operand.vmem [shape: f32[8,1], index: 6, kind: input, shape index: {}]   ;;  %s284_s7 = inlined_call_operand.hbm [shape: f32[8,128], index: 7, kind: output, shape index: {}]  }
   0x1   :  { %v28_v0 = vld [vmem:[%s277_s0] sm:$0x3]  ;;  %v169_v3 = vld [vmem:[%s278_s1] sm:$0x10]  ;;  %173 = vset.pattern.permute.xlu0 %v202_v6 }
   0x2   :  { %v160_v1 = vld [vmem:[%s278_s1] sm:$0xf]  ;;  %v54_v2 = vsel %vm52_vm0, %v28_v0, 0 }
   0x3   :  { %v31_v4 = vld [vmem:[%s279_s2] sm:$0xff]  ;;  %63 = vmatpush.bf16.msra.mxu0 %v54_v2  ;;  %v161_v5 = vor.u32 %v169_v3, %v160_v1 }
   0x4   :  { %12 = vsyncpa [#allocation3], 0  ;;  %35 = vperm.xlu0 %173, %v31_v4   ;;  %174 = vset.pattern.permute.xlu1 %v202_v6  ;;  %v32_v7 = vld [vmem:[%s279_s2 + $0x8] sm:$0x3]  ;;  %v75_v8 = vld [vmem:[%s281_s4] sm:$0xff]  ;;  %vm96_vm2 = vcmask 1044480  }
   0x5   :  { %175 = vset.pattern.permute.xlu2 %v202_v6  ;;  %79 = vperm.xlu1 %174, %v75_v8   ;;  %v76_v9 = vld [vmem:[%s281_s4 + $0x8] sm:$0xff]  ;;  %v170_v20 = vld [vmem:[%s280_s3] sm:$0xff]  ;;  %vm92_vm3 = vcmask 80896   ;;  %vm124_vm4 = vcmask 130048   ;;  %s203_s16 = smov [#allocation2]   ;;  %s149_s19 = sshll.u32 %s284_s7, 4  ;;  %s150_s19 = int_to_ptr.hbm [resolvable:$true] %s149_s19 }
   0x6   :  { %162 = vmatmul.msk.bf16.vlgmr.msra.gmra.mxu0 %vm48_vm1, %v161_v5  ;;  %v118_v21 = vld [vmem:[%s283_s6] sm:$0xff]  ;;  %s147_s6 = sshll.u32 %s203_s16, 4  ;;  %s148_s6 = int_to_ptr.vmem [resolvable:$true] %s147_s6 }
   0x7   :  { %121 = vperm.xlu2 %175, %v118_v21   ;;  %v117_v31 = vld [vmem:[%s282_s5] sm:$0xf] }
   0xc   :  { %40 = vperm.xlu0 %173, %v32_v7  }
   0xd   :  { %84 = vperm.xlu1 %174, %v76_v9  }
  0x61   :  { %v122_v32 = vpop.permute.xlu2 %121 }
  0x76   :  { %v36_v10 = vpop.permute.xlu0 %35 }
  0x77   :  { %v80_v22 = vpop.permute.xlu1 %79 }
  0x7e   :  { %v41_v13 = vpop.permute.xlu0 %40 }
  0x7f   :  { %v85_v25 = vpop.permute.xlu1 %84 }
  0x83   :  { %v65_v11 = vpop.f32.mrf.mxu0 }
  0x84   :  { %v66_v12 = vadd.f32 %v65_v11, %v36_v10 }
  0x86   :  { %v70_v16 = vmax.f32 %v66_v12, 0.0 }
  0x8b   :  { %v67_v14 = vpop.f32.mrf.mxu0 }
  0x8c   :  { %v68_v15 = vadd.f32 %v67_v14, %v41_v13 }
  0x8e   :  { %v71_v17 = vmax.f32 %v68_v15, 0.0 }
  0x90   :  { %v72_v18 = vpack.c.bf16 %v71_v17, %v70_v16 }
  0x92   :  { %v98_v19 = vsel %vm96_vm2, %v72_v18, 0 }
  0x93   :  { %107 = vmatpush.bf16.msra.mxu1 %v98_v19 }
  0x96   :  { %167 = vmatmul.msk.bf16.vlgmr.msra.gmra.mxu1 %vm92_vm3, %v170_v20 }
 0x113   :  { %v109_v23 = vpop.f32.mrf.mxu1 }
 0x114   :  { %v110_v24 = vadd.f32 %v109_v23, %v80_v22 }
 0x116   :  { %v114_v28 = vmax.f32 %v110_v24, 0.0 }
 0x11b   :  { %v111_v26 = vpop.f32.mrf.mxu1 }
 0x11c   :  { %v112_v27 = vadd.f32 %v111_v26, %v85_v25 }
 0x11e   :  { %v115_v29 = vmax.f32 %v112_v27, 0.0 }
 0x120   :  { %v116_v30 = vpack.c.bf16 %v115_v29, %v114_v28 }
 0x122   :  { %135 = vmatpush.bf16.msra.mxu2 %v116_v30 }
 0x125   :  { %168 = vmatmul.msk.bf16.vlgmr.msra.gmra.mxu2 %vm124_vm4, %v117_v31 }
 0x1a8   :  { %v137_v33 = vpop.f32.mrf.mxu2 }
 0x1a9   :  { %v138_v34 = vadd.f32 %v137_v33, %v122_v32 }
 0x1ab   :  { %141 = vst [vmem:[#allocation2] sm:$0xff] %v138_v34 }
 0x1ac   :  { %152 = dma.vmem_to_hbm [thread:$0]  %s148_s6, 128, %s150_s19, [#allocation3]  }
 0x1b0   :  { %v139_v35 = vpop.f32.mrf.mxu2 }
 0x1b1   :  { %200 = dma.done.wait [#allocation3], 128  }
 0x1b2   :  { %201 = vsyncadd [#allocation3], 4294967168 }
 0x1b3   :  { %157 = vsyncpa [#allocation3], 1 }

</bundles_post_ra>
